<compile_context>
chip_gen: v5e
topology: v5e:2x2
jax: 0.10.0
libtpu: 0.0.40
codegen_flags: <defaults>
</compile_context>

<pallas_src>
import functools

import jax
import jax.numpy as jnp
from jax.experimental import pallas as pl
from jax.experimental.pallas import tpu as pltpu


def _round_up(x, m):
    return (x + m - 1) // m * m


def _cdiv(a, b):
    return -(-a // b)


def _vmem_capacity_bytes():
    try:
        info = pltpu.get_tpu_info()
        return int(getattr(info, "vmem_capacity_bytes", 64 * 1024 * 1024))
    except Exception:
        return 64 * 1024 * 1024          # conservative default (v7x per-TC VMEM)


# ---------------------------------------------------------------------------
# Pass 1: partial per-channel sum / sum-of-squares over chunks of rows.
# Grid = (chunks, row_tiles): chunk axis is "parallel" (v7x megacore shards it
# across both TensorCores); the row-tile axis is an "arbitrary" reduction with
# the (1, 1, C) output block resident as the accumulator.
# ---------------------------------------------------------------------------
def bn_stats_kernel(x_ref, sum_ref, sq_ref):
    i = pl.program_id(1)

    @pl.when(i == 0)
    def _init():
        sum_ref[...] = jnp.zeros_like(sum_ref)
        sq_ref[...] = jnp.zeros_like(sq_ref)

    x = x_ref[...].astype(jnp.float32)                  # (TR1, C_in) bf16 -> f32
    s1 = jnp.sum(x, axis=0, keepdims=True)              # (1, C_in)
    s2 = jnp.sum(x * x, axis=0, keepdims=True)
    sum_ref[...] += s1.reshape(sum_ref.shape)
    sq_ref[...] += s2.reshape(sq_ref.shape)


# ---------------------------------------------------------------------------
# Pass 2: BN affine + ReLU + 2x2 avg-pool (3 VPU adds; 0.25 folded into the
# weights) + 1x1-conv matmul on the MXU (bf16 operands, f32 accumulation).
# ---------------------------------------------------------------------------
def transition_main_kernel(x_ref, scale_ref, shift_ref, w_ref, o_ref, *, c_pad):
    scale = scale_ref[...]                              # (1, C_pad) f32
    shift = shift_ref[...]
    x = x_ref[...]                                      # (TR, 4*C_pad) bf16
    acc = None
    for k in range(4):                                  # unrolled pooling-window slots
        xs = x[:, k * c_pad:(k + 1) * c_pad].astype(jnp.float32)  # lane-aligned slice
        r = jnp.maximum(xs * scale + shift, 0.0)        # BN affine + ReLU (f32 VPU)
        acc = r if acc is None else acc + r
    # 0.25 pooling factor already folded into w_ref in the wrapper (exact in bf16).
    out = jnp.dot(acc.astype(jnp.bfloat16), w_ref[...],
                  preferred_element_type=jnp.float32)   # (TR, Co_pad)
    o_ref[...] = out.astype(o_ref.dtype)


def transition_forward(x_nchw, gamma, beta, w_conv, *, eps=1e-5):
    N, C_in, H, W = x_nchw.shape
    C_out = w_conv.shape[0]
    assert H % 2 == 0 and W % 2 == 0, "2x2 avg-pool path assumes even H, W"
    Hh, Wh = H // 2, W // 2
    R = N * Hh * Wh                                     # pooled pixels = matmul rows
    R_flat = N * H * W                                  # pre-pool pixels (BN stats rows)

    C_pad = _round_up(C_in, 128)                        # MXU/lane aligned K
    Co_pad = _round_up(C_out, 128)                      # lane-dense output stores

    # ---- generation-aware VMEM budgets --------------------------------------
    vmem_cap = _vmem_capacity_bytes()                   # 128 MiB v5e/v6e, 64 MiB/TC v7x
    vmem_budget = int(vmem_cap * 0.7)                   # tile-sizing budget
    vmem_limit = int(vmem_cap * 0.85)                   # scoped limit handed to Mosaic

    # ---- layout plumbing (XLA); activations staged in bf16 ------------------
    x_nhwc = jnp.transpose(x_nchw, (0, 2, 3, 1)).astype(jnp.bfloat16)
    x_flat = x_nhwc.reshape(R_flat, C_in)               # pass-1 input, no lane padding
    xw = x_nhwc.reshape(N, Hh, 2, Wh, 2, C_in).transpose(0, 1, 3, 2, 4, 5)
    x2d = jnp.pad(xw.reshape(R, 4, C_in),               # pass-2 input: window slots on lanes
                  ((0, 0), (0, 0), (0, C_pad - C_in))).reshape(R, 4 * C_pad)

    # ---- pass 1 tiling: NC "parallel" chunks x "arbitrary" row tiles ---------
    NC = 2 if R_flat >= 16 else 1
    c_lane = _round_up(C_in, 128)                       # VMEM lane footprint per row
    tr1_cap = max(8, ((vmem_budget // 3) // (4 * c_lane)) // 8 * 8)
    tr1_cap = min(tr1_cap, 32768)
    rows_per_chunk = _round_up(_cdiv(R_flat, NC), 8)
    tiles1 = max(1, _cdiv(rows_per_chunk, tr1_cap))
    TR1 = _round_up(_cdiv(rows_per_chunk, tiles1), 8)
    R1_pad = NC * tiles1 * TR1
    if R1_pad != R_flat:                                # zero rows don't perturb the sums
        x_flat = jnp.pad(x_flat, ((0, R1_pad - R_flat), (0, 0)))

    psum, psq = pl.pallas_call(
        bn_stats_kernel,
        out_shape=(jax.ShapeDtypeStruct((NC, 1, C_in), jnp.float32),
                   jax.ShapeDtypeStruct((NC, 1, C_in), jnp.float32)),
        grid_spec=pltpu.PrefetchScalarGridSpec(
            num_scalar_prefetch=0,
            grid=(NC, tiles1),
            in_specs=[pl.BlockSpec((TR1, C_in),
                                   lambda c, i: (c * tiles1 + i, 0))],
            out_specs=(pl.BlockSpec((1, 1, C_in), lambda c, i: (c, 0, 0)),
                       pl.BlockSpec((1, 1, C_in), lambda c, i: (c, 0, 0)))),
        compiler_params=pltpu.CompilerParams(
            dimension_semantics=("parallel", "arbitrary"),
            vmem_limit_bytes=vmem_limit),
    )(x_flat)

    # ---- BN finalize (tiny per-channel math) in plain XLA --------------------
    inv_count = 1.0 / float(N * H * W)
    mean = jnp.sum(psum, axis=(0, 1)) * inv_count       # (C_in,) f32
    var = jnp.maximum(jnp.sum(psq, axis=(0, 1)) * inv_count - mean * mean, 0.0)
    inv = jax.lax.rsqrt(var + float(eps))
    scale = gamma.astype(jnp.float32) * inv
    shift = beta.astype(jnp.float32) - mean * scale
    scale2 = jnp.pad(scale, (0, C_pad - C_in)).reshape(1, C_pad)
    shift2 = jnp.pad(shift, (0, C_pad - C_in)).reshape(1, C_pad)

    # ---- conv weights: (C_in, C_out), 0.25 pool factor folded in, bf16 -------
    w2 = jnp.pad(w_conv.reshape(C_out, C_in).T.astype(jnp.float32) * 0.25,
                 ((0, C_pad - C_in), (0, Co_pad - C_out))).astype(jnp.bfloat16)

    # ---- pass 2 tiling: largest row tile that fits the VMEM budget -----------
    per_row = 2 * (4 * C_pad * 2) + 2 * (Co_pad * 4)    # double-buffered bf16 in + f32 out
    fixed = 2 * C_pad * Co_pad * 2 + 4 * C_pad * 4 + (2 << 20)
    TR = max(8, ((vmem_budget - fixed) // per_row) // 8 * 8)
    TR = min(TR, 8192, _round_up(R, 8))
    R_pad = _round_up(R, TR)
    if R_pad != R:
        x2d = jnp.pad(x2d, ((0, R_pad - R), (0, 0)))
    num_tiles = R_pad // TR

    out2d = pl.pallas_call(
        functools.partial(transition_main_kernel, c_pad=C_pad),
        out_shape=jax.ShapeDtypeStruct((R_pad, Co_pad), jnp.float32),
        grid_spec=pltpu.PrefetchScalarGridSpec(
            num_scalar_prefetch=0,
            grid=(num_tiles,),
            in_specs=[pl.BlockSpec((TR, 4 * C_pad), lambda i: (i, 0)),
                      pl.BlockSpec((1, C_pad), lambda i: (0, 0)),
                      pl.BlockSpec((1, C_pad), lambda i: (0, 0)),
                      pl.BlockSpec((C_pad, Co_pad), lambda i: (0, 0))],
            out_specs=pl.BlockSpec((TR, Co_pad), lambda i: (i, 0))),
        compiler_params=pltpu.CompilerParams(
            dimension_semantics=("parallel",),
            vmem_limit_bytes=vmem_limit),
    )(x2d, scale2, shift2, w2)

    # back to PyTorch's NCHW output layout; drop row/channel padding
    return out2d[:R, :C_out].reshape(N, Hh, Wh, C_out).transpose(0, 3, 1, 2)


if __name__ == "__main__":
    key = jax.random.PRNGKey(0)
    k1, k2, k3, k4 = jax.random.split(key, 4)

    N, C_in, H, W = 2, 4, 16, 16
    C_out = 2  # out_planes

    x = jax.random.normal(k1, (N, C_in, H, W), jnp.float32)
    gamma = 1.0 + 0.1 * jax.random.normal(k2, (C_in,), jnp.float32)     # bn1.weight
    beta = 0.1 * jax.random.normal(k3, (C_in,), jnp.float32)            # bn1.bias
    w_conv = jax.random.normal(k4, (C_out, C_in, 1, 1), jnp.float32) / jnp.sqrt(C_in)

    out = jax.block_until_ready(transition_forward(x, gamma, beta, w_conv))

    # plain-JAX reference (same math as the PyTorch module, training-mode BN)
    eps = 1e-5
    mean = x.mean(axis=(0, 2, 3), keepdims=True)
    var = ((x - mean) ** 2).mean(axis=(0, 2, 3), keepdims=True)
    xn = (x - mean) / jnp.sqrt(var + eps) * gamma.reshape(1, C_in, 1, 1) \
         + beta.reshape(1, C_in, 1, 1)
    r = jnp.maximum(xn, 0.0)
    conv = jnp.einsum("nchw,oc->nohw", r, w_conv[:, :, 0, 0])
    ref = conv.reshape(N, C_out, H // 2, 2, W // 2, 2).mean(axis=(3, 5))

    assert out.shape == (N, C_out, H // 2, W // 2), out.shape
    max_err = float(jnp.max(jnp.abs(out - ref)))
    # bf16-staged activations + bf16 MXU operands (f32 accumulation) -> loosened tolerance
    assert jnp.allclose(out, ref, rtol=3e-2, atol=3e-2), max_err
    print("KERNEL_OK")
</pallas_src>

<mosaic_0001>
module attributes {stable_mosaic.version = 11 : i64} {
  func.func @bn_stats_kernel(%arg0: i32, %arg1: i32, %arg2: memref<256x4xbf16, #tpu.memory_space<vmem>>, %arg3: memref<1x1x4xf32, #tpu.memory_space<vmem>>, %arg4: memref<1x1x4xf32, #tpu.memory_space<vmem>>) attributes {dimension_semantics = [#tpu.dimension_semantics<parallel>, #tpu.dimension_semantics<arbitrary>], iteration_bounds = array<i64: 2, 1>, scalar_prefetch = 0 : i64, scratch_operands = 0 : i64, tpu.core_type = #tpu.core_type<tc>, window_params = [{transform_indices = @transform_0, window_bounds = array<i64: 256, 4>}, {transform_indices = @transform_1, window_bounds = array<i64: 1, 1, 4>}, {transform_indices = @transform_2, window_bounds = array<i64: 1, 1, 4>}]} {
    %c0_i32 = arith.constant 0 : i32
    %0 = arith.cmpi eq, %arg1, %c0_i32 : i32
    %1 = arith.extui %0 : i1 to i32
    %c0_i32_0 = arith.constant 0 : i32
    %2 = arith.cmpi ne, %1, %c0_i32_0 : i32
    scf.if %2 {
      %cst_15 = arith.constant 0.000000e+00 : f32
      %18 = vector.broadcast %cst_15 : f32 to vector<1x1x4xf32>
      %c0_16 = arith.constant 0 : index
      %c0_17 = arith.constant 0 : index
      %c0_18 = arith.constant 0 : index
      %19 = vector.load %arg3[%c0_16, %c0_17, %c0_18] : memref<1x1x4xf32, #tpu.memory_space<vmem>>, vector<1x1x4xf32>
      tpu.vector_store %arg3[%c0_16, %c0_17, %c0_18], %18 {strides = array<i32>} : memref<1x1x4xf32, #tpu.memory_space<vmem>>, vector<1x1x4xf32>,
      %cst_19 = arith.constant 0.000000e+00 : f32
      %20 = vector.broadcast %cst_19 : f32 to vector<1x1x4xf32>
      %c0_20 = arith.constant 0 : index
      %c0_21 = arith.constant 0 : index
      %c0_22 = arith.constant 0 : index
      %21 = vector.load %arg4[%c0_20, %c0_21, %c0_22] : memref<1x1x4xf32, #tpu.memory_space<vmem>>, vector<1x1x4xf32>
      tpu.vector_store %arg4[%c0_20, %c0_21, %c0_22], %20 {strides = array<i32>} : memref<1x1x4xf32, #tpu.memory_space<vmem>>, vector<1x1x4xf32>,
    } else {
    }
    %c0 = arith.constant 0 : index
    %c0_1 = arith.constant 0 : index
    %3 = vector.load %arg2[%c0, %c0_1] : memref<256x4xbf16, #tpu.memory_space<vmem>>, vector<256x4xbf16>
    %4 = arith.extf %3 : vector<256x4xbf16> to vector<256x4xf32>
    %cst = arith.constant dense<0.000000e+00> : vector<4xf32>
    %5 = vector.multi_reduction <add>, %4, %cst [0] : vector<256x4xf32> to vector<4xf32>
    %6 = vector.shape_cast %5 : vector<4xf32> to vector<1x4xf32>
    %7 = arith.mulf %4, %4 : vector<256x4xf32>
    %cst_2 = arith.constant dense<0.000000e+00> : vector<4xf32>
    %8 = vector.multi_reduction <add>, %7, %cst_2 [0] : vector<256x4xf32> to vector<4xf32>
    %9 = vector.shape_cast %8 : vector<4xf32> to vector<1x4xf32>
    %c0_3 = arith.constant 0 : index
    %c0_4 = arith.constant 0 : index
    %c0_5 = arith.constant 0 : index
    %10 = vector.load %arg3[%c0_3, %c0_4, %c0_5] : memref<1x1x4xf32, #tpu.memory_space<vmem>>, vector<1x1x4xf32>
    %11 = vector.shape_cast %6 : vector<1x4xf32> to vector<1x1x4xf32>
    %12 = arith.addf %10, %11 : vector<1x1x4xf32>
    %c0_6 = arith.constant 0 : index
    %c0_7 = arith.constant 0 : index
    %c0_8 = arith.constant 0 : index
    %13 = vector.load %arg3[%c0_6, %c0_7, %c0_8] : memref<1x1x4xf32, #tpu.memory_space<vmem>>, vector<1x1x4xf32>
    tpu.vector_store %arg3[%c0_6, %c0_7, %c0_8], %12 {strides = array<i32>} : memref<1x1x4xf32, #tpu.memory_space<vmem>>, vector<1x1x4xf32>,
    %c0_9 = arith.constant 0 : index
    %c0_10 = arith.constant 0 : index
    %c0_11 = arith.constant 0 : index
    %14 = vector.load %arg4[%c0_9, %c0_10, %c0_11] : memref<1x1x4xf32, #tpu.memory_space<vmem>>, vector<1x1x4xf32>
    %15 = vector.shape_cast %9 : vector<1x4xf32> to vector<1x1x4xf32>
    %16 = arith.addf %14, %15 : vector<1x1x4xf32>
    %c0_12 = arith.constant 0 : index
    %c0_13 = arith.constant 0 : index
    %c0_14 = arith.constant 0 : index
    %17 = vector.load %arg4[%c0_12, %c0_13, %c0_14] : memref<1x1x4xf32, #tpu.memory_space<vmem>>, vector<1x1x4xf32>
    tpu.vector_store %arg4[%c0_12, %c0_13, %c0_14], %16 {strides = array<i32>} : memref<1x1x4xf32, #tpu.memory_space<vmem>>, vector<1x1x4xf32>,
    return
  }
  func.func @transform_0(%arg0: i32, %arg1: i32) -> (i32, i32) {
    %c1_i32 = arith.constant 1 : i32
    %0 = arith.muli %arg0, %c1_i32 : i32
    %1 = arith.addi %0, %arg1 : i32
    %c0_i32 = arith.constant 0 : i32
    %c0_i32_0 = arith.constant 0 : i32
    return %1, %c0_i32 : i32, i32
  }
  func.func @transform_1(%arg0: i32, %arg1: i32) -> (i32, i32, i32) {
    %c0_i32 = arith.constant 0 : i32
    %c0_i32_0 = arith.constant 0 : i32
    %c0_i32_1 = arith.constant 0 : i32
    return %arg0, %c0_i32, %c0_i32_0 : i32, i32, i32
  }
  func.func @transform_2(%arg0: i32, %arg1: i32) -> (i32, i32, i32) {
    %c0_i32 = arith.constant 0 : i32
    %c0_i32_0 = arith.constant 0 : i32
    %c0_i32_1 = arith.constant 0 : i32
    return %arg0, %c0_i32, %c0_i32_0 : i32, i32, i32
  }
}

</mosaic_0001>

<bundles_post_ra>
// kernel: tpu_custom_call.1
= control target key start
LH: loop header
LB: loop body
LE: loop exit
PB: predicated region body
PF: predicated region fallthrough
CT: control target
= control target key end

     0   :  { %8 = vsyncpa [#allocation3], 0  ;;  %s1033_s0 = inlined_call_operand.vmem [shape: bf16[512,4], index: 0, kind: input, shape index: {}]   ;;  %s1034_s1 = inlined_call_operand.hbm [shape: f32[2,1,4], index: 1, kind: output, shape index: {0}]   ;;  %s1035_s2 = inlined_call_operand.hbm [shape: f32[2,1,4], index: 2, kind: output, shape index: {1}]  }
   0x1   :  { %10 = vsyncpa [#allocation3 + $0x1], 0 }
   0x2   :  { %11 = vsyncpa [#allocation5], 0 }
   0x3   :  { %13 = vsyncpa [#allocation5 + $0x1], 0  ;;  %s819_s9 = smov 0   ;;  %s821_s10 = smov 0  }
   0x4   :  { %s823_s11 = smov 0   ;;  %s825_s12 = smov 0  }
   0x5   :  { %s827_s13 = smov 0   ;;  %s829_s14 = smov 0  }
   0x6 LB: > { %s542_s15 = sadd.s32 4294967295, %s801_s14   ;;  %s543_s16 = sadd.s32 4294967294, %s801_s14   ;;  %s801_s14 = sphi %s829_s14, %s19_s14   ;;  %s797_s13 = sphi %s827_s13, %s1042_s13   ;;  %s793_s12 = sphi %s825_s12, %s1041_s12   ;;  %s789_s11 = sphi %s823_s11, %s1040_s11   ;;  %s785_s10 = sphi %s821_s10, %s1039_s10   ;;  %s781_s9 = sphi %s819_s9, %s1038_s9  }
   0x7   : > { %s31_s17 = sadd.s32 1, %s797_s13  ;;  %s66_s18 = sadd.s32 1, %s789_s11 }
   0x8   : > { %p33_p0 = scmp.ge.s32.totalorder %s31_s17, 2  ;;  %p76_p1 = scmp.ne.s32.totalorder %s789_s11, %s785_s10 }
   0x9   : > { %p77_p2 = scmp.eq.s32.totalorder %s542_s15, 1  ;;  %p82_p3 = scmp.ne.s32.totalorder %s785_s10, %s781_s9 }
   0xa   : > { %s1044_s17 = smov (%p33_p0, %s31_s17), 0  ;;  %p83_p5 = scmp.eq.s32.totalorder %s543_s16, 1 }
   0xb   : > { %p859_p4 = por %p77_p2, %p76_p1  ;;  %s63_s20 = ssub.s32 %s797_s13, %s1044_s17 }
   0xc   : > { %p546_p6 = scmp.ge.s32.totalorder %s801_s14, 1  ;;  %p64_p7 = scmp.eq.s32.totalorder %s63_s20, 0 }
   0xd   : > { %p866_p8 = por %p83_p5, %p82_p3  ;;  %p138_p9 = scmp.lt.s32.totalorder %s801_s14, 3 }
   0xe   : > { %s872_s22 = scalar_select %p64_p7, %s789_s11, %s66_s18  }
   0xf   : > { %p139_p10 = pnand %p546_p6, %p138_p9 }
  0x10   : > { %s875_s23 = sand.u32 (!%p139_p10), 1, %s785_s10   ;;  %s547_s24 = sshll.u32 (!%p139_p10), %s793_s12, 5 }
  0x11   : > { %142 = sbr.rel (%p139_p10) target bundleno = 122 (0x7a), region = 24  ;;  %s879_s25 = scalar_lea.vmem (!%p139_p10), [#allocation2], %s875_s23 }
  0x12   : > { %p166_p11 = scmp.lt.s32.totalorder (!%p139_p10), %s547_s24, 63  ;;  %s884_s26 = scalar_lea.vmem (!%p139_p10), [#allocation4], %s875_s23 }
  0x13   : > { %s434_s5 = scalar_lea.hbm (!%p139_p10), %s1034_s1, %s793_s12  ;;  %s436_s6 = sshll.u32 (!%p139_p10), %s879_s25, 4  ;;  %s437_s6 = int_to_ptr.vmem [resolvable:$true] %s436_s6 }
  0x14   : > { %s438_s7 = sshll.u32 (!%p139_p10), %s434_s5, 4  ;;  %s422_s8 = scalar_lea.sflag (!%p139_p10), [#allocation3], %s875_s23  ;;  %s439_s7 = int_to_ptr.hbm [resolvable:$true] %s438_s7 }
  0x15   : > { %s705_s15 = sshra.s32 (!%p139_p10), %s439_s7, 4  ;;  %s706_s15 = int_to_ptr.hbm [resolvable:$true] %s705_s15 }
  0x16   : > { %vm176_vm0 = vcmask 24576   ;;  %v803_v0 = vmov 0.0   ;;  %s1046_s24 = smov (!%p166_p11, %s547_s24), 63  ;;  %vm243_vm1 = vcmask 31744   ;;  %s707_s16 = scalar_lea.hbm %s706_s15, 1 }
  0x17   : > { %177 = vst.msk [vmem:[%s879_s25] sm:$0x1] %vm176_vm0, %v803_v0  ;;  %s548_s27 = sshll.u32 %s1046_s24, 2  ;;  %p708_p12 = scmp.ne.s32.totalorder %s706_s15, %s707_s16 }
  0x18   : > { %178 = vst.msk [vmem:[%s884_s26] sm:$0x1] %vm176_vm0, %v803_v0  ;;  %s891_s30 = scalar_lea.vmem %s1033_s0, %s548_s27  ;;  %s711_s24 = scalar_lea.hbm %s1034_s1, 2 }
  0x19   : > { %v552_v1 = vld [vmem:[%s891_s30] sm:$0xff]   ;;  %v615_v2 = vld [vmem:[%s891_s30 + $0x8] sm:$0xff]   ;;  %v616_v6 = vld [vmem:[%s891_s30 + $0x10] sm:$0xff]   ;;  %p709_p13 = pnand %p708_p12, %p859_p4  ;;  %p712_p1 = scmp.lt.s32.totalorder %s706_s15, %s1034_s1 }
  0x1a   : > { %v553_v3 = vunpack.c.l.bf16 %v552_v1  ;;  %v554_v4 = vunpack.c.h.bf16 %v552_v1  ;;  %v557_v5 = vunpack.c.l.bf16 %v615_v2  ;;  %v558_v7 = vunpack.c.h.bf16 %v615_v2  ;;  %v617_v14 = vld [vmem:[%s891_s30 + $0x18] sm:$0xff]   ;;  %v618_v21 = vld [vmem:[%s891_s30 + $0x20] sm:$0xff]   ;;  %v619_v31 = vld [vmem:[%s891_s30 + $0x28] sm:$0xff]   ;;  %p713_p2 = scmp.lt.s32.totalorder %s711_s24, %s707_s16 }
  0x1b   : > { %v561_v12 = vunpack.c.l.bf16 %v616_v6  ;;  %v562_v16 = vunpack.c.h.bf16 %v616_v6  ;;  %v565_v19 = vunpack.c.l.bf16 %v617_v14  ;;  %v566_v23 = vunpack.c.h.bf16 %v617_v14  ;;  %v620_v44 = vld [vmem:[%s891_s30 + $0x30] sm:$0xff]   ;;  %v621_v57 = vld [vmem:[%s891_s30 + $0x38] sm:$0xff]   ;;  %v622_v6 = vld [vmem:[%s891_s30 + $0x40] sm:$0xff]   ;;  %p710_p0 = pneg %p709_p13 }
  0x1c   : > { %v244_v8 = vsel %vm243_vm1, %v553_v3, 0.0  ;;  %v245_v9 = vsel %vm243_vm1, %v554_v4, 0.0  ;;  %v247_v10 = vsel %vm243_vm1, %v557_v5, 0.0  ;;  %v249_v13 = vsel %vm243_vm1, %v558_v7, 0.0  ;;  %p714_p3 = por %p713_p2, %p712_p1 }
  0x1d   : > { %v246_v11 = vadd.f32 %v245_v9, %v244_v8  ;;  %v251_v17 = vsel %vm243_vm1, %v561_v12, 0.0  ;;  %v253_v20 = vsel %vm243_vm1, %v562_v16, 0.0  ;;  %v255_v24 = vsel %vm243_vm1, %v565_v19, 0.0 }
  0x1e   : > { %v313_v25 = vmul.f32 %v553_v3, %v553_v3  ;;  %v314_v27 = vmul.f32 %v554_v4, %v554_v4  ;;  %v315_v28 = vmul.f32 %v557_v5, %v557_v5  ;;  %v569_v29 = vunpack.c.l.bf16 %v618_v21  ;;  %p715_p5 = pnand %p714_p3, %p710_p0 }
  0x1f   : > { %v248_v15 = vadd.f32 %v247_v10, %v246_v11  ;;  %v257_v30 = vsel %vm243_vm1, %v566_v23, 0.0  ;;  %v316_v33 = vmul.f32 %v558_v7, %v558_v7  ;;  %v570_v34 = vunpack.c.h.bf16 %v618_v21 }
  0x20   : > { %v259_v35 = vsel %vm243_vm1, %v569_v29, 0.0  ;;  %v345_v36 = vsel %vm243_vm1, %v313_v25, 0.0  ;;  %v317_v38 = vmul.f32 %v561_v12, %v561_v12  ;;  %v346_v39 = vsel %vm243_vm1, %v314_v27, 0.0 }
  0x21   : > { %v250_v18 = vadd.f32 %v249_v13, %v248_v15  ;;  %v348_v40 = vsel %vm243_vm1, %v315_v28, 0.0  ;;  %v573_v41 = vunpack.c.l.bf16 %v619_v31  ;;  %v261_v42 = vsel %vm243_vm1, %v570_v34, 0.0 }
  0x22   : > { %v347_v43 = vadd.f32 %v346_v39, %v345_v36  ;;  %v318_v46 = vmul.f32 %v562_v16, %v562_v16  ;;  %v350_v47 = vsel %vm243_vm1, %v316_v33, 0.0  ;;  %v574_v48 = vunpack.c.h.bf16 %v619_v31 }
  0x23   : > { %v252_v22 = vadd.f32 %v251_v17, %v250_v18  ;;  %v263_v49 = vsel %vm243_vm1, %v573_v41, 0.0  ;;  %v319_v52 = vmul.f32 %v565_v19, %v565_v19  ;;  %v352_v53 = vsel %vm243_vm1, %v317_v38, 0.0  ;;  %v623_v19 = vld [vmem:[%s891_s30 + $0x48] sm:$0xff]  }
  0x24   : > { %v349_v50 = vadd.f32 %v348_v40, %v347_v43  ;;  %v577_v54 = vunpack.c.l.bf16 %v620_v44  ;;  %v265_v55 = vsel %vm243_vm1, %v574_v48, 0.0  ;;  %v320_v59 = vmul.f32 %v566_v23, %v566_v23 }
  0x25   : > { %v254_v26 = vadd.f32 %v253_v20, %v252_v22  ;;  %v354_v60 = vsel %vm243_vm1, %v318_v46, 0.0  ;;  %v578_v61 = vunpack.c.h.bf16 %v620_v44  ;;  %v321_v1 = vmul.f32 %v569_v29, %v569_v29 }
  0x26   : > { %v351_v56 = vadd.f32 %v350_v47, %v349_v50  ;;  %v267_v62 = vsel %vm243_vm1, %v577_v54, 0.0  ;;  %v356_v2 = vsel %vm243_vm1, %v319_v52, 0.0  ;;  %v581_v3 = vunpack.c.l.bf16 %v621_v57 }
  0x27   : > { %v256_v32 = vadd.f32 %v255_v24, %v254_v26  ;;  %v269_v4 = vsel %vm243_vm1, %v578_v61, 0.0  ;;  %v322_v8 = vmul.f32 %v570_v34, %v570_v34  ;;  %v358_v9 = vsel %vm243_vm1, %v320_v59, 0.0 }
  0x28   : > { %v353_v63 = vadd.f32 %v352_v53, %v351_v56  ;;  %v582_v10 = vunpack.c.h.bf16 %v621_v57  ;;  %v271_v11 = vsel %vm243_vm1, %v581_v3, 0.0  ;;  %v323_v14 = vmul.f32 %v573_v41, %v573_v41 }
  0x29   : > { %v258_v37 = vadd.f32 %v257_v30, %v256_v32  ;;  %v360_v15 = vsel %vm243_vm1, %v321_v1, 0.0  ;;  %v585_v16 = vunpack.c.l.bf16 %v622_v6  ;;  %v324_v21 = vmul.f32 %v574_v48, %v574_v48  ;;  %v624_v32 = vld [vmem:[%s891_s30 + $0x50] sm:$0xff]  }
  0x2a   : > { %v355_v5 = vadd.f32 %v354_v60, %v353_v63  ;;  %v273_v17 = vsel %vm243_vm1, %v582_v10, 0.0  ;;  %v362_v22 = vsel %vm243_vm1, %v322_v8, 0.0  ;;  %v586_v23 = vunpack.c.h.bf16 %v622_v6 }
  0x2b   : > { %v260_v45 = vadd.f32 %v259_v35, %v258_v37  ;;  %v275_v24 = vsel %vm243_vm1, %v585_v16, 0.0  ;;  %v325_v27 = vmul.f32 %v577_v54, %v577_v54  ;;  %v364_v28 = vsel %vm243_vm1, %v323_v14, 0.0 }
  0x2c   : > { %v357_v12 = vadd.f32 %v356_v2, %v355_v5  ;;  %v589_v29 = vunpack.c.l.bf16 %v623_v19  ;;  %v277_v30 = vsel %vm243_vm1, %v586_v23, 0.0  ;;  %v326_v34 = vmul.f32 %v578_v61, %v578_v61 }
  0x2d   : > { %v262_v51 = vadd.f32 %v261_v42, %v260_v45  ;;  %v366_v35 = vsel %vm243_vm1, %v324_v21, 0.0  ;;  %v590_v36 = vunpack.c.h.bf16 %v623_v19  ;;  %v327_v40 = vmul.f32 %v581_v3, %v581_v3  ;;  %v625_v45 = vld [vmem:[%s891_s30 + $0x58] sm:$0xff]  }
  0x2e   : > { %v359_v18 = vadd.f32 %v358_v9, %v357_v12  ;;  %v279_v37 = vsel %vm243_vm1, %v589_v29, 0.0  ;;  %v368_v41 = vsel %vm243_vm1, %v325_v27, 0.0  ;;  %v593_v42 = vunpack.c.l.bf16 %v624_v32 }
  0x2f   : > { %v264_v58 = vadd.f32 %v263_v49, %v262_v51  ;;  %v281_v43 = vsel %vm243_vm1, %v590_v36, 0.0  ;;  %v328_v47 = vmul.f32 %v582_v10, %v582_v10  ;;  %v370_v48 = vsel %vm243_vm1, %v326_v34, 0.0 }
  0x30   : > { %v361_v25 = vadd.f32 %v360_v15, %v359_v18  ;;  %v594_v49 = vunpack.c.h.bf16 %v624_v32  ;;  %v283_v50 = vsel %vm243_vm1, %v593_v42, 0.0  ;;  %v329_v53 = vmul.f32 %v585_v16, %v585_v16 }
  0x31   : > { %v266_v0 = vadd.f32 %v265_v55, %v264_v58  ;;  %v372_v54 = vsel %vm243_vm1, %v327_v40, 0.0  ;;  %v597_v55 = vunpack.c.l.bf16 %v625_v45  ;;  %v626_v58 = vld [vmem:[%s891_s30 + $0x60] sm:$0xff]   ;;  %v330_v60 = vmul.f32 %v586_v23, %v586_v23 }
  0x32   : > { %v363_v31 = vadd.f32 %v362_v22, %v361_v25  ;;  %v285_v56 = vsel %vm243_vm1, %v594_v49, 0.0  ;;  %v374_v61 = vsel %vm243_vm1, %v328_v47, 0.0  ;;  %v331_v2 = vmul.f32 %v589_v29, %v589_v29 }
  0x33   : > { %v268_v7 = vadd.f32 %v267_v62, %v266_v0  ;;  %v598_v62 = vunpack.c.h.bf16 %v625_v45  ;;  %v287_v63 = vsel %vm243_vm1, %v597_v55, 0.0  ;;  %v376_v3 = vsel %vm243_vm1, %v329_v53, 0.0 }
  0x34   : > { %v365_v38 = vadd.f32 %v364_v28, %v363_v31  ;;  %v332_v9 = vmul.f32 %v590_v36, %v590_v36  ;;  %v378_v10 = vsel %vm243_vm1, %v330_v60, 0.0  ;;  %v333_v15 = vmul.f32 %v593_v42, %v593_v42 }
  0x35   : > { %v270_v13 = vadd.f32 %v269_v4, %v268_v7  ;;  %v601_v4 = vunpack.c.l.bf16 %v626_v58  ;;  %v289_v5 = vsel %vm243_vm1, %v598_v62, 0.0  ;;  %v627_v7 = vld [vmem:[%s891_s30 + $0x68] sm:$0xff]   ;;  %v380_v16 = vsel %vm243_vm1, %v331_v2, 0.0 }
  0x36   : > { %v367_v44 = vadd.f32 %v366_v35, %v365_v38  ;;  %v334_v22 = vmul.f32 %v594_v49, %v594_v49  ;;  %v382_v23 = vsel %vm243_vm1, %v332_v9, 0.0  ;;  %v335_v28 = vmul.f32 %v597_v55, %v597_v55 }
  0x37   : > { %v272_v20 = vadd.f32 %v271_v11, %v270_v13  ;;  %v602_v11 = vunpack.c.h.bf16 %v626_v58  ;;  %v291_v12 = vsel %vm243_vm1, %v601_v4, 0.0  ;;  %v384_v29 = vsel %vm243_vm1, %v333_v15, 0.0 }
  0x38   : > { %v369_v51 = vadd.f32 %v368_v41, %v367_v44  ;;  %v336_v35 = vmul.f32 %v598_v62, %v598_v62  ;;  %v386_v36 = vsel %vm243_vm1, %v334_v22, 0.0  ;;  %v337_v41 = vmul.f32 %v601_v4, %v601_v4 }
  0x39   : > { %v274_v26 = vadd.f32 %v273_v17, %v272_v20  ;;  %v605_v17 = vunpack.c.l.bf16 %v627_v7  ;;  %v293_v18 = vsel %vm243_vm1, %v602_v11, 0.0  ;;  %v628_v20 = vld [vmem:[%s891_s30 + $0x70] sm:$0xff]   ;;  %v388_v42 = vsel %vm243_vm1, %v335_v28, 0.0 }
  0x3a   : > { %v371_v57 = vadd.f32 %v370_v48, %v369_v51  ;;  %v338_v47 = vmul.f32 %v602_v11, %v602_v11  ;;  %v390_v48 = vsel %vm243_vm1, %v336_v35, 0.0 }
  0x3b   : > { %v276_v33 = vadd.f32 %v275_v24, %v274_v26  ;;  %v606_v24 = vunpack.c.h.bf16 %v627_v7  ;;  %v295_v25 = vsel %vm243_vm1, %v605_v17, 0.0  ;;  %v339_v53 = vmul.f32 %v605_v17, %v605_v17 }
  0x3c   : > { %v373_v0 = vadd.f32 %v372_v54, %v371_v57  ;;  %v392_v54 = vsel %vm243_vm1, %v337_v41, 0.0 }
  0x3d   : > { %v278_v39 = vadd.f32 %v277_v30, %v276_v33  ;;  %v609_v30 = vunpack.c.l.bf16 %v628_v20  ;;  %v297_v31 = vsel %vm243_vm1, %v606_v24, 0.0  ;;  %v629_v33 = vld [vmem:[%s891_s30 + $0x78] sm:$0xff]   ;;  %v340_v58 = vmul.f32 %v606_v24, %v606_v24 }
  0x3e   : > { %v375_v6 = vadd.f32 %v374_v61, %v373_v0  ;;  %v614_v49 = vunpack.c.h.bf16 %v629_v33 }
  0x3f   : > { %v280_v46 = vadd.f32 %v279_v37, %v278_v39  ;;  %v610_v37 = vunpack.c.h.bf16 %v628_v20  ;;  %v299_v38 = vsel %vm243_vm1, %v609_v30, 0.0  ;;  %v341_v62 = vmul.f32 %v609_v30, %v609_v30 }
  0x40   : > { %v377_v13 = vadd.f32 %v376_v3, %v375_v6  ;;  %v305_v55 = vsel %vm243_vm1, %v614_v49, 0.0  ;;  %v398_v3 = vsel %vm243_vm1, %v340_v58, 0.0 }
  0x41   : > { %v282_v52 = vadd.f32 %v281_v43, %v280_v46  ;;  %v613_v43 = vunpack.c.l.bf16 %v629_v33  ;;  %v301_v44 = vsel %vm243_vm1, %v610_v37, 0.0  ;;  %v342_v2 = vmul.f32 %v610_v37, %v610_v37 }
  0x42   : > { %v379_v19 = vadd.f32 %v378_v10, %v377_v13  ;;  %v400_v7 = vsel %vm243_vm1, %v341_v62, 0.0  ;;  %v344_v10 = vmul.f32 %v614_v49, %v614_v49 }
  0x43   : > { %v284_v59 = vadd.f32 %v283_v50, %v282_v52  ;;  %v303_v50 = vsel %vm243_vm1, %v613_v43, 0.0  ;;  %v343_v6 = vmul.f32 %v613_v43, %v613_v43  ;;  %v402_v11 = vsel %vm243_vm1, %v342_v2, 0.0 }
  0x44   : > { %v381_v26 = vadd.f32 %v380_v16, %v379_v19  ;;  %v406_v17 = vsel %vm243_vm1, %v344_v10, 0.0 }
  0x45   : > { %v286_v1 = vadd.f32 %v285_v56, %v284_v59  ;;  %v394_v59 = vsel %vm243_vm1, %v338_v47, 0.0 }
  0x46   : > { %v383_v32 = vadd.f32 %v382_v23, %v381_v26 }
  0x47   : > { %v288_v8 = vadd.f32 %v287_v63, %v286_v1  ;;  %v396_v63 = vsel %vm243_vm1, %v339_v53, 0.0 }
  0x48   : > { %v385_v39 = vadd.f32 %v384_v29, %v383_v32 }
  0x49   : > { %v290_v14 = vadd.f32 %v289_v5, %v288_v8 }
  0x4a   : > { %v387_v45 = vadd.f32 %v386_v36, %v385_v39 }
  0x4b   : > { %v292_v21 = vadd.f32 %v291_v12, %v290_v14  ;;  %v404_v14 = vsel %vm243_vm1, %v343_v6, 0.0 }
  0x4c   : > { %v389_v51 = vadd.f32 %v388_v42, %v387_v45 }
  0x4d   : > { %v294_v27 = vadd.f32 %v293_v18, %v292_v21  ;;  %v414_v18 = vld [vmem:[%s879_s25] sm:$0x1] }
  0x4e   : > { %v391_v56 = vadd.f32 %v390_v48, %v389_v51 }
  0x4f   : > { %v296_v34 = vadd.f32 %v295_v25, %v294_v27 }
  0x50   : > { %v393_v60 = vadd.f32 %v392_v54, %v391_v56 }
  0x51   : > { %v298_v40 = vadd.f32 %v297_v31, %v296_v34 }
  0x52   : > { %v395_v0 = vadd.f32 %v394_v59, %v393_v60 }
  0x53   : > { %v300_v46 = vadd.f32 %v299_v38, %v298_v40 }
  0x54   : > { %v397_v4 = vadd.f32 %v396_v63, %v395_v0 }
  0x55   : > { %v302_v52 = vadd.f32 %v301_v44, %v300_v46 }
  0x56   : > { %v399_v8 = vadd.f32 %v398_v3, %v397_v4 }
  0x57   : > { %v304_v57 = vadd.f32 %v303_v50, %v302_v52 }
  0x58   : > { %v401_v12 = vadd.f32 %v400_v7, %v399_v8 }
  0x59   : > { %v306_v61 = vadd.f32 %v305_v55, %v304_v57 }
  0x5a   : > { %v403_v15 = vadd.f32 %v402_v11, %v401_v12 }
  0x5b   : > { %v307_v1 = vrot.slane %v306_v61, 4 }
  0x5c   : > { %v405_v19 = vadd.f32 %v404_v14, %v403_v15 }
  0x5d   : > { %v308_v5 = vadd.f32 %v307_v1, %v306_v61 }
  0x5e   : > { %v407_v21 = vadd.f32 %v406_v17, %v405_v19 }
  0x5f   : > { %v309_v9 = vrot.slane %v308_v5, 2 }
  0x60   : > { %v408_v23 = vrot.slane %v407_v21, 4 }
  0x61   : > { %v310_v13 = vadd.f32 %v309_v9, %v308_v5 }
  0x62   : > { %v409_v24 = vadd.f32 %v408_v23, %v407_v21 }
  0x63   : > { %v311_v16 = vrot.slane %v310_v13, 1 }
  0x65   : > { %v312_v20 = vadd.f32 %v311_v16, %v310_v13 }
  0x67   : > { %v415_v22 = vadd.f32 %v414_v18, %v312_v20 }
  0x69   : > { %417 = vst.msk [vmem:[%s879_s25] sm:$0x1] %vm176_vm0, %v415_v22 }
  0x6a   : > { %718 = shalt.err (!%p715_p5)
}
  0x6b   : > { %630 = dma.vmem_to_hbm [thread:$0]  (%p859_p4), %s437_s6, 16, %s439_s7, %s422_s8   ;;  %v410_v25 = vrot.slane %v409_v24, 2  ;;  %v418_v28 = vld [vmem:[%s884_s26] sm:$0x1] }
  0x6c   : > { %s447_s30 = scalar_lea.hbm %s1035_s2, %s793_s12  ;;  %s449_s3 = sshll.u32 %s884_s26, 4  ;;  %s450_s3 = int_to_ptr.vmem [resolvable:$true] %s449_s3 }
  0x6d   : > { %v411_v26 = vadd.f32 %v410_v25, %v409_v24  ;;  %s451_s4 = sshll.u32 %s447_s30, 4  ;;  %s426_s5 = scalar_lea.sflag [#allocation5], %s875_s23  ;;  %s452_s4 = int_to_ptr.hbm [resolvable:$true] %s451_s4 }
  0x6e   : > { %s733_s15 = sshra.s32 %s452_s4, 4  ;;  %s739_s8 = scalar_lea.hbm %s1035_s2, 2  ;;  %s734_s15 = int_to_ptr.hbm [resolvable:$true] %s733_s15 }
  0x6f   : > { %v412_v27 = vrot.slane %v411_v26, 1  ;;  %s735_s6 = scalar_lea.hbm %s734_s15, 1  ;;  %p740_p10 = scmp.lt.s32.totalorder %s734_s15, %s1035_s2 }
  0x70   : > { %p736_p6 = scmp.ne.s32.totalorder %s734_s15, %s735_s6  ;;  %p741_p11 = scmp.lt.s32.totalorder %s739_s8, %s735_s6 }
  0x71   : > { %v413_v29 = vadd.f32 %v412_v27, %v411_v26 }
  0x72   : > { %p737_p7 = pnand %p736_p6, %p859_p4  ;;  %p742_p12 = por %p741_p11, %p740_p10 }
  0x73   : > { %v419_v30 = vadd.f32 %v418_v28, %v413_v29 }
  0x74   : > { %p738_p9 = pneg %p737_p7 }
  0x75   : > { %420 = vst.msk [vmem:[%s884_s26] sm:$0x1] %vm176_vm0, %v419_v30 }
  0x76   : > { %p743_p13 = pnand %p742_p12, %p738_p9 }
  0x78   : > { %746 = shalt.err (!%p743_p13)
}
  0x79   : > { %631 = dma.vmem_to_hbm [thread:$0]  (%p859_p4), %s450_s3, 16, %s452_s4, %s426_s5  }
  0x7a PF: > { %p641_p0 = scmp.ge.s32.totalorder %s801_s14, 2  ;;  %s463_s23 = sand.u32 1, %s781_s9  }
  0x7b   : > { %s464_s26 = scalar_lea.sflag [#allocation3], %s463_s23 }
  0x7c   : > { %p635_p1 = pnand %p641_p0, %p866_p8 }
  0x7e   : > { %p636_p2 = pneg %p635_p1 }
  0x80   : > { %772 = dma.done.wait (%p636_p2), %s464_s26, 16  }
  0x81   : > { %774 = vsyncadd (%p636_p2), %s464_s26, 4294967280  ;;  %s473_s20 = scalar_lea.sflag [#allocation5], %s463_s23 }
  0x82   : > { %776 = dma.done.wait (%p636_p2), %s473_s20, 16  }
  0x83   : > { %778 = vsyncadd (%p636_p2), %s473_s20, 4294967280  ;;  %s19_s14 = sadd.s32 1, %s801_s14   ;;  %s1038_s9 = smov %s785_s10 }
  0x84   : > { %p16_p3 = scmp.ge.s32.totalorder %s19_s14, 4   ;;  %s1039_s10 = smov %s789_s11 }
  0x85   : > { %s1040_s11 = smov %s872_s22  ;;  %s1041_s12 = smov %s797_s13 }
  0x86   : > { %s1042_s13 = smov %s1044_s17  ;;  %18 = sbr.rel (!%p16_p3) target bundleno = 6 (0x6), region = 80 }
  0x8b   :  { %478 = vsyncpa [#allocation3], 1 }
  0x8c   :  { %480 = vsyncpa [#allocation3 + $0x1], 1 }
  0x8d   :  { %481 = vsyncpa [#allocation5], 1 }
  0x8e   :  { %483 = vsyncpa [#allocation5 + $0x1], 1 }

</bundles_post_ra>
